<compile_context>
chip_gen: v6e
topology: v6e:2x2x1
jax: 0.10.0
libtpu: 0.0.40
codegen_flags: <defaults>
</compile_context>

<pallas_src>
import jax
import jax.numpy as jnp
from jax.experimental import pallas as pl
from jax.experimental.pallas import tpu as pltpu

PI = 3.14159                      # matches the torch.jit.script constant
A_CONST = (2.0 * PI) ** 0.5


def gaussian_kernel(y_ref, p_ref, o_ref):
    # y: (TM, 1)  — pre-fused mul*x + bias per row (compute dtype)
    # p: (3, K)   — rows = [mean, w = -0.5*inv_std^2, coeff = inv_std/sqrt(2*pi)]
    # o: (TM, K)  — module parameter dtype
    y = y_ref[...]
    mean = p_ref[0:1, :]
    w = p_ref[1:2, :]
    coeff = p_ref[2:3, :]
    t = y - mean                                   # (TM, K) via lane broadcast
    o_ref[...] = (jnp.exp(t * t * w) * coeff).astype(o_ref.dtype)


def _round_up(a, b):
    return (a + b - 1) // b * b


def gaussian_layer(x, edge_type, means_w, stds_w, mul_w, bias_w, *,
                   tm=4096, compute_dtype=jnp.float32):
    """Pallas implementation of GaussianLayer.forward.

    x:          (B, N, N) float
    edge_type:  (B, N, N) int32 in [0, edge_types)
    means_w:    (1, K), stds_w: (1, K)
    mul_w:      (edge_types, 1), bias_w: (edge_types, 1)
    returns     (B, N, N, K) with dtype of means_w
    """
    B, N1, N2 = x.shape
    K = means_w.shape[-1]
    out_dtype = means_w.dtype

    # Embedding gathers + per-row affine (mul*x + bias) fused in the wrapper:
    # this is O(M) work vs the kernel's O(M*K), and collapses 3 input streams
    # into one.  Done in x's dtype to match torch's `.type_as(x)` semantics.
    mul = mul_w[edge_type, 0].astype(x.dtype)       # (B, N1, N2)
    bias = bias_w[edge_type, 0].astype(x.dtype)     # (B, N1, N2)
    y = (mul * x + bias).astype(compute_dtype)      # (B, N1, N2)

    M = B * N1 * N2
    # Big row tiles (amortize the ~0.35 us/step pipeline overhead), but keep
    # at least 2 grid steps so the "parallel" axis can feed both TensorCores,
    # and keep the sublane block dim a multiple of 8.
    tm_eff = min(tm, _round_up(max(pl.cdiv(M, 2), 8), 8))
    grid = (pl.cdiv(M, tm_eff),)                    # masked tail stores, no pad

    yf = y.reshape(M, 1)

    # Hoisted parameter math (exact, once): abs+eps, reciprocal, -0.5/std^2,
    # 1/(sqrt(2*pi)*std).  The kernel is then pure sub/mul + one exp (EUP).
    mean = means_w.reshape(1, K).astype(jnp.float32)
    std = jnp.abs(stds_w.reshape(1, K).astype(jnp.float32)) + 1e-5
    inv_std = 1.0 / std
    w = -0.5 * inv_std * inv_std
    coeff = inv_std * (1.0 / A_CONST)
    params = jnp.concatenate([mean, w, coeff], axis=0).astype(compute_dtype)

    # VMEM budget: double-buffered output tile + the (tm, 1) input block,
    # which is lane-padded to 128 lanes in VMEM (costs as much as a full tile).
    out_tile_bytes = tm_eff * K * jnp.dtype(out_dtype).itemsize
    y_tile_bytes = tm_eff * 128 * jnp.dtype(compute_dtype).itemsize
    vmem_bytes = min(2 * (out_tile_bytes + y_tile_bytes) + (4 << 20), 48 << 20)

    out = pl.pallas_call(
        gaussian_kernel,
        out_shape=jax.ShapeDtypeStruct((M, K), out_dtype),
        grid_spec=pltpu.PrefetchScalarGridSpec(
            num_scalar_prefetch=0,
            grid=grid,
            in_specs=[
                pl.BlockSpec((tm_eff, 1), lambda i: (i, 0)),
                pl.BlockSpec((3, K), lambda i: (0, 0)),
            ],
            out_specs=pl.BlockSpec((tm_eff, K), lambda i: (i, 0)),
        ),
        compiler_params=pltpu.CompilerParams(
            dimension_semantics=("parallel",),
            vmem_limit_bytes=int(vmem_bytes)),
        cost_estimate=pl.CostEstimate(
            flops=6 * M * K,
            transcendentals=M * K,
            bytes_accessed=M * K * jnp.dtype(out_dtype).itemsize
                           + M * jnp.dtype(compute_dtype).itemsize
                           + 3 * K * jnp.dtype(compute_dtype).itemsize),
    )(yf, params)

    return out.reshape(B, N1, N2, K)


def reference(x, edge_type, means_w, stds_w, mul_w, bias_w):
    K = means_w.shape[-1]
    mul = mul_w[edge_type].astype(x.dtype)     # (B,N,N,1)
    bias = bias_w[edge_type].astype(x.dtype)
    y = mul * x[..., None] + bias              # (B,N,N,1)
    y = jnp.broadcast_to(y, y.shape[:-1] + (K,)).astype(jnp.float32)
    mean = means_w.reshape(-1).astype(jnp.float32)
    std = jnp.abs(stds_w.reshape(-1).astype(jnp.float32)) + 1e-5
    out = jnp.exp(-0.5 * ((y - mean) / std) ** 2) / (A_CONST * std)
    return out.astype(means_w.dtype)


if __name__ == "__main__":
    K = 128
    edge_types = 1024

    key = jax.random.PRNGKey(0)
    k_means, k_stds, k_x, k_et = jax.random.split(key, 4)

    # Deterministic parameter init matching nn.init in __init__.
    means_w = jax.random.uniform(k_means, (1, K), jnp.float32, 0.0, 3.0)
    stds_w = jax.random.uniform(k_stds, (1, K), jnp.float32, 0.0, 3.0)
    mul_w = jnp.ones((edge_types, 1), jnp.float32)    # constant 1
    bias_w = jnp.zeros((edge_types, 1), jnp.float32)  # constant 0

    # Case 1: divisible row count (B*N*N multiple of the row tile).
    B, N = 2, 8
    x = jax.random.uniform(k_x, (B, N, N), jnp.float32, 0.0, 5.0)
    edge_type = jax.random.randint(k_et, (B, N, N), 0, edge_types, jnp.int32)

    out = gaussian_layer(x, edge_type, means_w, stds_w, mul_w, bias_w)
    out = jax.block_until_ready(out)
    ref = reference(x, edge_type, means_w, stds_w, mul_w, bias_w)
    assert out.shape == (B, N, N, K)
    assert out.dtype == means_w.dtype
    assert jnp.allclose(out, ref, rtol=1e-5, atol=1e-5)

    # Case 2: non-divisible row count — exercises the masked tail block path
    # (no padding / post-slice in the wrapper anymore).
    B2, N2 = 2, 9
    x2 = jax.random.uniform(k_x, (B2, N2, N2), jnp.float32, 0.0, 5.0)
    edge_type2 = jax.random.randint(k_et, (B2, N2, N2), 0, edge_types, jnp.int32)

    out2 = gaussian_layer(x2, edge_type2, means_w, stds_w, mul_w, bias_w)
    out2 = jax.block_until_ready(out2)
    ref2 = reference(x2, edge_type2, means_w, stds_w, mul_w, bias_w)
    assert out2.shape == (B2, N2, N2, K)
    assert out2.dtype == means_w.dtype
    assert jnp.allclose(out2, ref2, rtol=1e-5, atol=1e-5)

    print("KERNEL_OK")
</pallas_src>

<mosaic_0001>
module attributes {stable_mosaic.version = 11 : i64} {
  func.func @gaussian_kernel(%arg0: i32, %arg1: memref<64x1xf32, #tpu.memory_space<vmem>>, %arg2: memref<3x128xf32, #tpu.memory_space<vmem>>, %arg3: memref<64x128xf32, #tpu.memory_space<vmem>>) attributes {dimension_semantics = [#tpu.dimension_semantics<parallel>], iteration_bounds = array<i64: 2>, scalar_prefetch = 0 : i64, scratch_operands = 0 : i64, tpu.core_type = #tpu.core_type<tc>, window_params = [{transform_indices = @transform_0, window_bounds = array<i64: 64, 1>}, {pipeline_mode = #tpu.pipeline_mode<synchronous>, transform_indices = @transform_1, window_bounds = array<i64: 3, 128>}, {transform_indices = @transform_2, window_bounds = array<i64: 64, 128>}]} {
    %c0 = arith.constant 0 : index
    %c0_0 = arith.constant 0 : index
    %0 = vector.load %arg1[%c0, %c0_0] : memref<64x1xf32, #tpu.memory_space<vmem>>, vector<64x1xf32>
    %c0_1 = arith.constant 0 : index
    %c0_2 = arith.constant 0 : index
    %1 = vector.load %arg2[%c0_1, %c0_2] : memref<3x128xf32, #tpu.memory_space<vmem>>, vector<1x128xf32>
    %c1 = arith.constant 1 : index
    %c0_3 = arith.constant 0 : index
    %2 = vector.load %arg2[%c1, %c0_3] : memref<3x128xf32, #tpu.memory_space<vmem>>, vector<1x128xf32>
    %c2 = arith.constant 2 : index
    %c0_4 = arith.constant 0 : index
    %3 = vector.load %arg2[%c2, %c0_4] : memref<3x128xf32, #tpu.memory_space<vmem>>, vector<1x128xf32>
    %4 = vector.broadcast %0 : vector<64x1xf32> to vector<64x128xf32>
    %5 = vector.broadcast %1 : vector<1x128xf32> to vector<64x128xf32>
    %6 = arith.subf %4, %5 : vector<64x128xf32>
    %7 = arith.mulf %6, %6 : vector<64x128xf32>
    %8 = vector.broadcast %2 : vector<1x128xf32> to vector<64x128xf32>
    %9 = arith.mulf %7, %8 : vector<64x128xf32>
    %10 = math.exp %9 : vector<64x128xf32>
    %11 = vector.broadcast %3 : vector<1x128xf32> to vector<64x128xf32>
    %12 = arith.mulf %10, %11 : vector<64x128xf32>
    %c0_5 = arith.constant 0 : index
    %c0_6 = arith.constant 0 : index
    %13 = vector.load %arg3[%c0_5, %c0_6] : memref<64x128xf32, #tpu.memory_space<vmem>>, vector<64x128xf32>
    tpu.vector_store %arg3[%c0_5, %c0_6], %12 {strides = array<i32>} : memref<64x128xf32, #tpu.memory_space<vmem>>, vector<64x128xf32>,
    return
  }
  func.func @transform_0(%arg0: i32) -> (i32, i32) {
    %c0_i32 = arith.constant 0 : i32
    %c0_i32_0 = arith.constant 0 : i32
    return %arg0, %c0_i32 : i32, i32
  }
  func.func @transform_1(%arg0: i32) -> (i32, i32) {
    %c0_i32 = arith.constant 0 : i32
    %c0_i32_0 = arith.constant 0 : i32
    %c0_i32_1 = arith.constant 0 : i32
    return %c0_i32, %c0_i32_0 : i32, i32
  }
  func.func @transform_2(%arg0: i32) -> (i32, i32) {
    %c0_i32 = arith.constant 0 : i32
    %c0_i32_0 = arith.constant 0 : i32
    return %arg0, %c0_i32 : i32, i32
  }
}

</mosaic_0001>

<bundles_post_ra>
// kernel: tpu_custom_call.1
= control target key start
LH: loop header
LB: loop body
LE: loop exit
PB: predicated region body
PF: predicated region fallthrough
CT: control target
= control target key end

     0   :  { %7 = vsyncpa [#allocation3], 0  ;;  %s611_s0 = inlined_call_operand.vmem [shape: f32[128,1], index: 0, kind: input, shape index: {}]   ;;  %s612_s1 = inlined_call_operand.vmem [shape: f32[3,128], index: 1, kind: input, shape index: {}]   ;;  %s613_s2 = inlined_call_operand.hbm [shape: f32[128,128], index: 2, kind: output, shape index: {}]  }
   0x1   :  { %9 = vsyncpa [#allocation3 + $0x1], 0  ;;  %s497_s9 = smov 0   ;;  %s499_s10 = smov 0  }
   0x2   :  { %s501_s11 = smov 0   ;;  %s503_s12 = smov 0  }
   0x3 LB: > { %s518_s13 = sadd.s32 4294967295, %s476_s12   ;;  %s340_s14 = sadd.s32 4294967294, %s476_s12   ;;  %s476_s12 = sphi %s503_s12, %s619_s12   ;;  %s472_s11 = sphi %s501_s11, %s618_s11   ;;  %s468_s10 = sphi %s499_s10, %s617_s10   ;;  %s464_s9 = sphi %s497_s9, %s616_s9  }
   0x4   : > { %s522_s15 = sadd.s32 1, %s476_s12   ;;  %s69_s16 = sadd.s32 1, %s472_s11 }
   0x5   : > { %s66_s17 = ssub.s32 %s476_s12, %s522_s15  ;;  %p79_p0 = scmp.ne.s32.totalorder %s472_s11, %s468_s10 }
   0x6   : > { %p67_p1 = scmp.eq.s32.totalorder %s66_s17, 0  ;;  %p80_p2 = scmp.eq.s32.totalorder %s518_s13, 1 }
   0x7   : > { %p85_p3 = scmp.ne.s32.totalorder %s468_s10, %s464_s9  ;;  %p86_p4 = scmp.eq.s32.totalorder %s340_s14, 1 }
   0x8   : > { %s533_s18 = scalar_select %p67_p1, %s472_s11, %s69_s16  }
   0x9   : > { %p535_p5 = por %p80_p2, %p79_p0  ;;  %p539_p6 = por %p86_p4, %p85_p3 }
   0xa   : > { %p343_p7 = scmp.ge.s32.totalorder %s476_s12, 1  ;;  %p116_p8 = scmp.lt.s32.totalorder %s476_s12, 3 }
   0xc   : > { %p117_p9 = pnand %p343_p7, %p116_p8 }
   0xd   : > { %s345_s21 = sshll.u32 (!%p117_p9), %s518_s13, 3  ;;  %s135_s30 = sand.u32 (!%p117_p9), 1, %s468_s10  }
   0xe   : > { %120 = sbr.rel (%p117_p9) target bundleno = 198 (0xc6), region = 28  ;;  %p139_p10 = scmp.lt.s32.totalorder (!%p117_p9), %s345_s21, 15 }
   0xf   : > { %s344_s3 = sshll.u32 (!%p117_p9), %s135_s30, 6  ;;  %s355_s7 = sshll.u32 (!%p117_p9), %s518_s13, 10 }
  0x10   : > { %s137_s6 = scalar_lea.vmem (!%p117_p9), [#allocation2], %s344_s3  ;;  %s565_s17 = scalar_lea.hbm (!%p117_p9), %s613_s2, %s355_s7 }
  0x11   : > { %s278_s8 = sshll.u32 (!%p117_p9), %s137_s6, 4  ;;  %s571_s13 = scalar_lea.sflag (!%p117_p9), [#allocation3], %s135_s30  ;;  %s567_s8 = int_to_ptr.vmem [resolvable:$true] %s278_s8 }
  0x13   : > { %v478_v0 = vmov 0   ;;  %s621_s21 = smov (!%p139_p10, %s345_s21), 15  ;;  %v347_v9 = vld [vmem:[%s612_s1] ss:$0 sm:$0xff]  ;;  %v348_v14 = vld [vmem:[%s612_s1 + $0x1] ss:$0 sm:$0xff] }
  0x14   : > { %399 = vset.pattern.permute.xlu1 %v478_v0  ;;  %398 = vset.pattern.permute.xlu0 %v478_v0  ;;  %s346_s22 = sshll.u32 %s621_s21, 3  ;;  %v349_v51 = vld [vmem:[%s612_s1 + $0x2] ss:$0 sm:$0xff]  ;;  %s416_s21 = scalar_lea.vmem %s567_s8, 1024 }
  0x15   : > { %s142_s25 = scalar_lea.vmem %s611_s0, %s346_s22  ;;  %p417_p11 = scmp.ne.s32.totalorder %s567_s8, %s416_s21 }
  0x16   : > { %v147_v1 = vld [vmem:[%s142_s25 + $0x10] sm:$0xff]  ;;  %v145_v2 = vld [vmem:[%s142_s25] sm:$0xff]  ;;  %v148_v3 = vld [vmem:[%s142_s25 + $0x18] sm:$0xff]  ;;  %s479_s22 = smov [#allocation2]  }
  0x17   : > { %168 = vperm.xlu1 %399, %v147_v1   ;;  %158 = vperm.xlu0 %398, %v145_v2   ;;  %v146_v4 = vld [vmem:[%s142_s25 + $0x8] sm:$0xff]  ;;  %v149_v6 = vld [vmem:[%s142_s25 + $0x20] sm:$0xff]  ;;  %v152_v7 = vld [vmem:[%s142_s25 + $0x38] sm:$0xff]  ;;  %p418_p12 = pnand %p417_p11, %p535_p5  ;;  %s420_s23 = sshll.u32 %s479_s22, 4  ;;  %s421_s23 = int_to_ptr.vmem [resolvable:$false] %s420_s23 }
  0x18   : > { %v150_v5 = vld [vmem:[%s142_s25 + $0x28] sm:$0xff]  ;;  %v151_v8 = vld [vmem:[%s142_s25 + $0x30] sm:$0xff]  ;;  %s422_s24 = scalar_lea.vmem %s421_s23, 2048  ;;  %p423_p0 = scmp.lt.s32.totalorder %s567_s8, %s421_s23 }
  0x19   : > { %p419_p13 = pneg %p418_p12  ;;  %p424_p1 = scmp.lt.s32.totalorder %s422_s24, %s416_s21 }
  0x1b   : > { %173 = vperm.xlu1 %399, %v148_v3   ;;  %163 = vperm.xlu0 %398, %v146_v4   ;;  %p425_p2 = por %p424_p1, %p423_p0 }
  0x1d   : > { %p426_p3 = pnand %p425_p2, %p419_p13 }
  0x1f   : > { %183 = vperm.xlu1 %399, %v150_v5   ;;  %178 = vperm.xlu0 %398, %v149_v6  }
  0x23   : > { %193 = vperm.xlu1 %399, %v152_v7   ;;  %188 = vperm.xlu0 %398, %v151_v8  }
  0x92   : > { %v169_v10 = vpop.permute.xlu1 %168  ;;  %v159_v11 = vpop.permute.xlu0 %158 }
  0x93   : > { %v202_v12 = vsub.f32 %v169_v10, %v347_v9  ;;  %v200_v13 = vsub.f32 %v159_v11, %v347_v9 }
  0x95   : > { %v210_v15 = vmul.f32 %v202_v12, %v202_v12  ;;  %v208_v16 = vmul.f32 %v200_v13, %v200_v13 }
  0x96   : > { %v174_v17 = vpop.permute.xlu1 %173  ;;  %v164_v18 = vpop.permute.xlu0 %163 }
  0x97   : > { %v222_v19 = vmul.f32 %v348_v14, %v210_v15  ;;  %v220_v20 = vmul.f32 %v348_v14, %v208_v16  ;;  %v203_v21 = vsub.f32 %v174_v17, %v347_v9  ;;  %v201_v22 = vsub.f32 %v164_v18, %v347_v9 }
  0x99   : > { %v232_v23 = vmul.f32 1.442695, %v222_v19  ;;  %v228_v24 = vmul.f32 1.442695, %v220_v20  ;;  %v211_v25 = vmul.f32 %v203_v21, %v203_v21  ;;  %v209_v26 = vmul.f32 %v201_v22, %v201_v22 }
  0x9a   : > { %v184_v27 = vpop.permute.xlu1 %183  ;;  %v179_v28 = vpop.permute.xlu0 %178 }
  0x9b   : > { %400 = vpow2.f32 %v232_v23  ;;  %v223_v29 = vmul.f32 %v348_v14, %v211_v25  ;;  %v221_v30 = vmul.f32 %v348_v14, %v209_v26  ;;  %v205_v31 = vsub.f32 %v184_v27, %v347_v9 }
  0x9c   : > { %402 = vpow2.f32 %v228_v24  ;;  %v204_v32 = vsub.f32 %v179_v28, %v347_v9 }
  0x9d   : > { %v234_v33 = vmul.f32 1.442695, %v223_v29  ;;  %v230_v34 = vmul.f32 1.442695, %v221_v30  ;;  %v213_v35 = vmul.f32 %v205_v31, %v205_v31 }
  0x9e   : > { %v212_v36 = vmul.f32 %v204_v32, %v204_v32  ;;  %v194_v37 = vpop.permute.xlu1 %193  ;;  %v189_v38 = vpop.permute.xlu0 %188 }
  0x9f   : > { %404 = vpow2.f32 %v234_v33  ;;  %v225_v39 = vmul.f32 %v348_v14, %v213_v35  ;;  %v207_v40 = vsub.f32 %v194_v37, %v347_v9  ;;  %v206_v41 = vsub.f32 %v189_v38, %v347_v9 }
  0xa0   : > { %406 = vpow2.f32 %v230_v34  ;;  %v224_v42 = vmul.f32 %v348_v14, %v212_v36 }
  0xa1   : > { %v238_v43 = vmul.f32 1.442695, %v225_v39  ;;  %v215_v44 = vmul.f32 %v207_v40, %v207_v40  ;;  %v214_v45 = vmul.f32 %v206_v41, %v206_v41 }
  0xa2   : > { %v236_v46 = vmul.f32 1.442695, %v224_v42 }
  0xa3   : > { %408 = vpow2.f32 %v238_v43  ;;  %v227_v47 = vmul.f32 %v348_v14, %v215_v44  ;;  %v226_v48 = vmul.f32 %v348_v14, %v214_v45 }
  0xa4   : > { %410 = vpow2.f32 %v236_v46 }
  0xa5   : > { %v242_v49 = vmul.f32 1.442695, %v227_v47  ;;  %v240_v50 = vmul.f32 1.442695, %v226_v48 }
  0xa7   : > { %412 = vpow2.f32 %v242_v49 }
  0xa8   : > { %v401_v52 = vpop.eup %400  ;;  %414 = vpow2.f32 %v240_v50 }
  0xa9   : > { %v403_v53 = vpop.eup %402  ;;  %v250_v54 = vmul.f32 %v401_v52, %v349_v51 }
  0xaa   : > { %v248_v55 = vmul.f32 %v403_v53, %v349_v51 }
  0xab   : > { %258 = vst [vmem:[%s137_s6 + $0x10] sm:$0xff] %v250_v54 }
  0xac   : > { %v405_v56 = vpop.eup %404  ;;  %256 = vst [vmem:[%s137_s6] sm:$0xff] %v248_v55 }
  0xad   : > { %v407_v57 = vpop.eup %406  ;;  %v251_v58 = vmul.f32 %v405_v56, %v349_v51 }
  0xae   : > { %v249_v59 = vmul.f32 %v407_v57, %v349_v51 }
  0xaf   : > { %259 = vst [vmem:[%s137_s6 + $0x18] sm:$0xff] %v251_v58 }
  0xb0   : > { %v409_v60 = vpop.eup %408  ;;  %257 = vst [vmem:[%s137_s6 + $0x8] sm:$0xff] %v249_v59 }
  0xb1   : > { %v411_v61 = vpop.eup %410  ;;  %v253_v62 = vmul.f32 %v409_v60, %v349_v51 }
  0xb2   : > { %v252_v63 = vmul.f32 %v411_v61, %v349_v51 }
  0xb3   : > { %261 = vst [vmem:[%s137_s6 + $0x28] sm:$0xff] %v253_v62 }
  0xb4   : > { %v413_v0 = vpop.eup %412  ;;  %260 = vst [vmem:[%s137_s6 + $0x20] sm:$0xff] %v252_v63 }
  0xb5   : > { %v415_v1 = vpop.eup %414  ;;  %v255_v2 = vmul.f32 %v413_v0, %v349_v51 }
  0xb6   : > { %v254_v3 = vmul.f32 %v415_v1, %v349_v51 }
  0xb7   : > { %263 = vst [vmem:[%s137_s6 + $0x38] sm:$0xff] %v255_v2 }
  0xb8   : > { %262 = vst [vmem:[%s137_s6 + $0x30] sm:$0xff] %v254_v3 }
  0xb9   : > { %429 = shalt.err (!%p426_p3)
}
  0xba   : > { %s430_s25 = scalar_lea.hbm %s565_s17, 1024  ;;  %s434_s28 = scalar_lea.hbm %s613_s2, 2048 }
  0xbb   : > { %p431_p4 = scmp.ne.s32.totalorder %s565_s17, %s430_s25  ;;  %p435_p9 = scmp.lt.s32.totalorder %s565_s17, %s613_s2 }
  0xbc   : > { %p436_p10 = scmp.lt.s32.totalorder %s434_s28, %s430_s25 }
  0xbd   : > { %p432_p7 = pnand %p431_p4, %p535_p5 }
  0xbe   : > { %p437_p11 = por %p436_p10, %p435_p9 }
  0xbf   : > { %p433_p8 = pneg %p432_p7 }
  0xc1   : > { %p438_p12 = pnand %p437_p11, %p433_p8 }
  0xc3   : > { %441 = shalt.err (!%p438_p12)
}
  0xc4   : > { %s480_s3 = smov 128   ;;  %s481_s4 = smov 8  }
  0xc5   : > { %356 = dma.vmem_to_hbm [thread:$0]  (%p535_p5), %s567_s8, 1024, %s565_s17, %s571_s13, %s480_s3, %s480_s3, %s481_s4  }
  0xc6 PF: > { %p362_p13 = scmp.ge.s32.totalorder %s476_s12, 2  ;;  %s293_s5 = sand.u32 1, %s464_s9  }
  0xc7   : > { %s294_s6 = scalar_lea.sflag [#allocation3], %s293_s5 }
  0xc8   : > { %p359_p0 = pnand %p362_p13, %p539_p6 }
  0xca   : > { %p360_p1 = pneg %p359_p0 }
  0xcc   : > { %459 = dma.done.wait (%p360_p1), %s294_s6, 1024  }
  0xcd   : > { %461 = vsyncadd (%p360_p1), %s294_s6, 4294966272  ;;  %p12_p2 = scmp.ge.s32.totalorder %s522_s15, 4   ;;  %s616_s9 = smov %s468_s10 }
  0xce   : > { %s617_s10 = smov %s472_s11  ;;  %s618_s11 = smov %s533_s18 }
  0xcf   : > { %s619_s12 = smov %s522_s15  ;;  %14 = sbr.rel (!%p12_p2) target bundleno = 3 (0x3), region = 63 }
  0xd4   :  { %299 = vsyncpa [#allocation3], 1 }
  0xd5   :  { %301 = vsyncpa [#allocation3 + $0x1], 1 }

</bundles_post_ra>
